<compile_context>
chip_gen: v7x
topology: tpu7x:2x2x1
jax: 0.10.0
libtpu: 0.0.40
codegen_flags: <defaults>
</compile_context>

<pallas_src>
import jax
import jax.numpy as jnp
from jax.experimental import pallas as pl
from jax.experimental.pallas import tpu as pltpu


def _embed_onehot_kernel(ids_ref, table_ref, out_ref):
    """Whole-table-resident embedding gather via one-hot MXU matmul.

    ids_ref:   (B_pad, 1) int32 class ids (padded rows hold 0, sliced later).
    table_ref: (n_classes, embed_dim) embedding table, fully VMEM resident.
    out_ref:   (B_pad, embed_dim) gathered rows.
    """
    ids = ids_ref[...]                                       # (B_pad, 1) int32
    b_pad = out_ref.shape[0]
    n_classes = table_ref.shape[0]
    # One-hot selection matrix: (B_pad, n_classes).
    class_iota = jax.lax.broadcasted_iota(jnp.int32, (b_pad, n_classes), 1)
    onehot = (class_iota == ids).astype(table_ref.dtype)
    # Single MXU matmul does the row gather; result is lane/sublane dense.
    out_ref[...] = jnp.dot(
        onehot, table_ref[...], preferred_element_type=jnp.float32
    ).astype(out_ref.dtype)


def class_embedder_forward(class_ids, embedding_table):
    """Pallas equivalent of ClassEmbedder.forward.

    Args:
      class_ids: (B,) integer class indices (batch[key]).
      embedding_table: (n_classes, embed_dim) float32 embedding weight
        (same layout as torch.nn.Embedding.weight).

    Returns:
      (B, 1, embed_dim) float32, matching the PyTorch module output.
    """
    # PyTorch ids are int64; int32 is sufficient for any realistic n_classes.
    class_ids = class_ids.astype(jnp.int32)
    B = class_ids.shape[0]
    n_classes, embed_dim = embedding_table.shape

    dtype_bytes = jnp.dtype(embedding_table.dtype).itemsize
    table_bytes = n_classes * embed_dim * dtype_bytes

    # Whole-table-resident design is only valid while the table fits VMEM
    # comfortably on every generation (v7x has 64 MiB per TC).
    # TODO(synk): for tables > ~48 MiB fall back to a data-dependent row-DMA
    # path fetching >=8 rows per step (not the ClassEmbedder regime).
    if table_bytes > 48 * 1024 * 1024:
        raise ValueError(
            "Embedding table too large for whole-table VMEM-resident gather."
        )

    # Pad batch to a multiple of 8 so the output block is sublane-dense
    # (unmasked full-vreg stores). Padded rows use id 0 and are sliced off.
    B_pad = max(8, ((B + 7) // 8) * 8)
    ids_pad = jnp.zeros((B_pad, 1), dtype=jnp.int32).at[:B, 0].set(class_ids)

    # Raise the scoped VMEM limit only if this kernel actually needs more
    # than the conservative default (never the case for real ClassEmbedders,
    # but keeps the guard explicit for v7x's smaller VMEM).
    needed_bytes = table_bytes + B_pad * embed_dim * dtype_bytes + B_pad * 4
    call_kwargs = {}
    if needed_bytes > 16 * 1024 * 1024:
        call_kwargs["compiler_params"] = pltpu.CompilerParams(
            vmem_limit_bytes=min(needed_bytes + (8 << 20), 60 * 1024 * 1024)
        )

    gathered = pl.pallas_call(
        _embed_onehot_kernel,
        out_shape=jax.ShapeDtypeStruct((B_pad, embed_dim), embedding_table.dtype),
        **call_kwargs,
    )(ids_pad, embedding_table)

    # PyTorch: batch[key][:, None] -> embedding -> (B, 1, embed_dim)
    return gathered[:B, None, :]


if __name__ == "__main__":
    # Small, deterministic setup consistent with the module.
    n_classes = 16
    embed_dim = 128
    batch = 4

    key = jax.random.PRNGKey(0)
    k_emb, k_ids = jax.random.split(key)

    # nn.Embedding default init: N(0, 1).
    embedding_table = jax.random.normal(
        k_emb, (n_classes, embed_dim), dtype=jnp.float32
    )
    class_ids = jax.random.randint(
        k_ids, (batch,), minval=0, maxval=n_classes, dtype=jnp.int32
    )

    out = class_embedder_forward(class_ids, embedding_table)
    out = jax.block_until_ready(out)

    # Reference check (plain JAX gather).
    ref = jnp.take(embedding_table, class_ids, axis=0)[:, None, :]
    assert out.shape == (batch, 1, embed_dim), out.shape
    assert out.dtype == jnp.float32
    assert jnp.allclose(out, ref), "mismatch vs reference embedding lookup"

    print("KERNEL_OK")
</pallas_src>

<mosaic_0001>
module attributes {stable_mosaic.version = 11 : i64} {
  func.func @_embed_onehot_kernel(%arg0: memref<8x1xi32, #tpu.memory_space<vmem>>, %arg1: memref<16x128xf32, #tpu.memory_space<vmem>>, %arg2: memref<8x128xf32, #tpu.memory_space<vmem>>) attributes {dimension_semantics = [], scalar_prefetch = 0 : i64, scratch_operands = 0 : i64, tpu.core_type = #tpu.core_type<tc>} {
    %c0 = arith.constant 0 : index
    %c0_0 = arith.constant 0 : index
    %0 = vector.load %arg0[%c0, %c0_0] : memref<8x1xi32, #tpu.memory_space<vmem>>, vector<8x1xi32>
    %1 = tpu.iota {dimensions = array<i32: 1>} : vector<8x16xi32>
    %2 = vector.broadcast %0 : vector<8x1xi32> to vector<8x16xi32>
    %3 = arith.cmpi eq, %1, %2 : vector<8x16xi32>
    %4 = arith.extui %3 : vector<8x16xi1> to vector<8x16xi32>
    %5 = arith.sitofp %4 : vector<8x16xi32> to vector<8x16xf32>
    %c0_1 = arith.constant 0 : index
    %c0_2 = arith.constant 0 : index
    %6 = vector.load %arg1[%c0_1, %c0_2] : memref<16x128xf32, #tpu.memory_space<vmem>>, vector<16x128xf32>
    %cst = arith.constant dense<0.000000e+00> : vector<8x128xf32>
    %7 = tpu.matmul %5, %6, %cst {dimension_numbers = #tpu.dot_dimension_numbers<[1], [0], [0], [1], [0, 0, 1, 1], [], []>} : vector<8x16xf32>, vector<16x128xf32>, vector<8x128xf32> -> vector<8x128xf32>
    %c0_3 = arith.constant 0 : index
    %c0_4 = arith.constant 0 : index
    %8 = vector.load %arg2[%c0_3, %c0_4] : memref<8x128xf32, #tpu.memory_space<vmem>>, vector<8x128xf32>
    tpu.vector_store %arg2[%c0_3, %c0_4], %7 {strides = array<i32>} : memref<8x128xf32, #tpu.memory_space<vmem>>, vector<8x128xf32>,
    return
  }
}

</mosaic_0001>

<bundles_post_ra>
// kernel: tpu_custom_call.1
= control target key start
LH: loop header
LB: loop body
LE: loop exit
PB: predicated region body
PF: predicated region fallthrough
CT: control target
= control target key end

     0   :  { %7 = vsyncpa [#allocation3], 0  ;;  %s249_s0 = inlined_call_operand.vmem [shape: s32[8,1], index: 0, kind: input, shape index: {}]   ;;  %s250_s1 = inlined_call_operand.hbm [shape: f32[16,128], index: 1, kind: input, shape index: {}]   ;;  %s251_s2 = inlined_call_operand.hbm [shape: f32[8,128], index: 2, kind: output, shape index: {}]  }
   0x1   :  { %8 = vsyncpa [#allocation4], 0  ;;  %s199_s9 = smov [#allocation2]   ;;  %s151_s13 = scalar_lea.hbm %s250_s1, 256 }
   0x2   :  { %s16_s10 = sshll.u32 %s199_s9, 4  ;;  %p152_p0 = scmp.ne.s32.totalorder %s250_s1, %s151_s13  ;;  %s17_s10 = int_to_ptr.vmem [resolvable:$true] %s16_s10 }
   0x3   :  { %p155_p1 = scmp.lt.u32.totalorder %s151_s13, %s250_s1 }
   0x5   :  { %p157_p2 = pnand %p155_p1, %p152_p0 }
   0x7   :  { %160 = shalt.err (!%p157_p2)
}
   0x8   :  { %s161_s18 = scalar_lea.vmem %s17_s10, 256  ;;  %p166_p4 = scmp.lt.s32.totalorder %s17_s10, %s17_s10 }
   0x9   :  { %p162_p3 = scmp.ne.s32.totalorder %s17_s10, %s161_s18  ;;  %p167_p5 = scmp.lt.s32.totalorder %s161_s18, %s161_s18 }
   0xb   :  { %p168_p6 = por %p167_p5, %p166_p4 }
   0xd   :  { %p169_p7 = pnand %p168_p6, %p162_p3 }
   0xf   :  { %172 = shalt.err (!%p169_p7)
}
  0x10   :  { %s200_s19 = smov 128   ;;  %s201_s20 = smov 8  }
  0x11   :  { %22 = dma.hbm_to_vmem [thread:$0]  %s250_s1, 256, %s17_s10, [#allocation3], %s200_s19, %s200_s19, %s201_s20  }
  0x12   :  { %195 = dma.done.wait [#allocation3], 256  }
  0x13   :  { %196 = vsyncadd [#allocation3], 4294967040  ;;  %v202_v0 = vmov 0   ;;  %v203_v1 = vmov 0.0|0.0   ;;  %v26_v2 = vld [vmem:[%s249_s0] sm:$0xff]  ;;  %v36_v4 = vld [vmem:[#allocation2 + $0x8] sm:$0xff]  ;;  %v27_v7 = vlaneseq }
  0x14   :  { %150 = vset.pattern.permute.xlu0 %v202_v0  ;;  %139 = vmatprep.subr.bf16.mxu0 %v203_v1  ;;  %v35_v3 = vld [vmem:[#allocation2] sm:$0xff]  ;;  %vm204_vm0 = vmmov 0   ;;  %v205_v6 = vmov 0.0   ;;  %vm37_vm1 = vcmask 130048   ;;  %s206_s1 = smov [#allocation5]  }
  0x15   :  { %30 = vperm.xlu0 %150, %v26_v2   ;;  %v140_v5 = vpack.c.bf16 %v36_v4, %v35_v3  ;;  %136 = vmatprep.mubr.msk.f32.mxu0 %vm204_vm0, %v205_v6  ;;  %v28_v8 = vand.u32 127, %v27_v7  ;;  %s118_s25 = sshll.u32 %s206_s1, 4  ;;  %s119_s25 = int_to_ptr.vmem [resolvable:$true] %s118_s25 }
  0x16   :  { %s173_s0 = scalar_lea.vmem %s119_s25, 128  ;;  %p178_p9 = scmp.lt.s32.totalorder %s119_s25, %s119_s25 }
  0x17   :  { %141 = vmatpush3.bf16.msra.mxu0 %v140_v5  ;;  %p174_p8 = scmp.ne.s32.totalorder %s119_s25, %s173_s0  ;;  %p179_p10 = scmp.lt.s32.totalorder %s173_s0, %s173_s0 }
  0x19   :  { %p180_p11 = por %p179_p10, %p178_p9 }
  0x1b   :  { %p181_p12 = pnand %p180_p11, %p174_p8 }
  0x94   :  { %v31_v9 = vpop.permute.xlu0 %30 }
  0x95   :  { %vm32_vm2 = vcmp.eq.s32.totalorder %v28_v8, %v31_v9 }
  0x96   :  { %v127_v10 = vsel %vm32_vm2, 1.0, %v205_v6 }
  0x97   :  { %137 = vmatmul.mubr.msk.f32.vlgmr.msra.gmra.mrb[0].mxu0 %vm37_vm1, %v127_v10 }
 0x16a   :  { %v107_v11 = vpop.f32.mrb[0].mxu0 }
 0x16b   :  { %111 = vst [vmem:[#allocation5] sm:$0xff] %v107_v11  ;;  %v138_v12 = vpop.f32.mrb[1].mxu0 }
 0x16c   :  { %184 = shalt.err (!%p181_p12)
}
 0x16d   :  { %s185_s28 = scalar_lea.hbm %s251_s2, 128 }
 0x16e   :  { %p186_p13 = scmp.ne.s32.totalorder %s251_s2, %s185_s28  ;;  %p189_p0 = scmp.lt.u32.totalorder %s185_s28, %s251_s2 }
 0x170   :  { %p191_p1 = pnand %p189_p0, %p186_p13 }
 0x172   :  { %194 = shalt.err (!%p191_p1)
}
 0x173   :  { %121 = dma.vmem_to_hbm [thread:$0]  %s119_s25, 128, %s251_s2, [#allocation4]  }
 0x174   :  { %197 = dma.done.wait [#allocation4], 128  }
 0x175   :  { %198 = vsyncadd [#allocation4], 4294967168 }
 0x176   :  { %125 = vsyncpa [#allocation3], 1 }
 0x177   :  { %126 = vsyncpa [#allocation4], 1 }

</bundles_post_ra>
